<compile_context>
chip_gen: v6e
topology: v6e:2x2x1
jax: 0.10.0
libtpu: 0.0.40
codegen_flags: <defaults>
</compile_context>

<pallas_src>
import functools

import jax
import jax.numpy as jnp
from jax.experimental import pallas as pl
from jax.experimental.pallas import tpu as pltpu


def _round_up(a, b):
    return ((a + b - 1) // b) * b


def _rowgroup_sum(vals):
    """Reduce (TB, D) -> (8, D) by summing 8-row groups (VPU adds only)."""
    tb, _ = vals.shape
    assert tb % 8 == 0
    acc = vals[0:8, :]
    for g in range(1, tb // 8):
        acc = acc + vals[g * 8:(g + 1) * 8, :]
    return acc


def _vfae_loss_kernel(scal_ref, xd_ref, x_ref, sd_ref, s_ref, mu_ref, lv_ref,
                      o_ref, acc_mse, acc_kl, *,
                      n, tb, tiles_per_core, need_mask):
    c = pl.program_id(0)          # core-split index ("parallel")
    i = pl.program_id(1)          # batch-tile index ("arbitrary" / reduction)

    @pl.when(i == 0)
    def _init():
        acc_mse[...] = jnp.zeros_like(acc_mse)
        acc_kl[...] = jnp.zeros_like(acc_kl)

    # Upcast in-kernel (inputs may be bf16); accumulate in f32.
    xd = xd_ref[...].astype(jnp.float32)
    xv = x_ref[...].astype(jnp.float32)
    mu = mu_ref[...].astype(jnp.float32)
    lv = lv_ref[...].astype(jnp.float32)

    diff = xd - xv
    if need_mask:
        gt = c * tiles_per_core + i                     # UNclamped global tile index
        row = gt * tb + jax.lax.broadcasted_iota(jnp.int32, (tb, 1), 0)
        valid = row < n
        diff = jnp.where(valid, diff, 0.0)
        mu = jnp.where(valid, mu, 0.0)                  # masked rows -> kl_elem == 0
        lv = jnp.where(valid, lv, 0.0)

    acc_mse[...] += _rowgroup_sum(diff * diff)
    kl_elem = jnp.exp(lv) + mu * mu - lv - 1.0
    acc_kl[...] += _rowgroup_sum(kl_elem)

    @pl.when(i == pl.num_programs(1) - 1)
    def _finalize():
        alpha = scal_ref[0]
        inv_n = scal_ref[1]
        inv_n_dx = scal_ref[2]

        mse_sum = jnp.sum(acc_mse[...])                 # one XLU reduce per core
        kl_sum = jnp.sum(acc_kl[...])

        # BCEWithLogitsLoss(s_decoded, s) on the lane-dense (1, N) arrays,
        # numerically stable: max(x,0) - x*t + log1p(exp(-|x|)).
        sd = sd_ref[...].astype(jnp.float32)
        st = s_ref[...].astype(jnp.float32)
        bce_elem = (jnp.maximum(sd, 0.0) - sd * st
                    + jnp.log1p(jnp.exp(-jnp.abs(sd))))
        bce_sum = jnp.sum(bce_elem)

        partial = mse_sum * inv_n_dx + 0.5 * kl_sum * inv_n
        # BCE is a whole-batch term: count it only on core slice 0.
        partial = partial + jnp.where(c == 0, alpha * inv_n * bce_sum, 0.0)
        o_ref[...] = jnp.broadcast_to(partial, o_ref.shape).astype(jnp.float32)


def _choose_tb(n, dx, z, x_itemsize, z_itemsize):
    # Double-buffered streamed tiles (x, x_decoded, mu, logvar) <= ~12 MiB.
    bytes_per_row = 2 * dx * x_itemsize + 2 * z * z_itemsize
    budget = 12 * 1024 * 1024
    tb = budget // max(2 * bytes_per_row, 1)
    tb = min(512, tb, _round_up(n, 8))
    return max(8, (int(tb) // 8) * 8)


def vfae_loss(y_pred, x, y, s, alpha=0.7, *, tb=None, num_core_splits=2):
    """Pallas implementation of VFAELoss.forward. Returns a scalar float32."""
    del y  # y.squeeze().long() in the reference does not affect the result

    x_dec = y_pred["x_decoded"]
    s_dec = y_pred["s_decoded"]
    mu = y_pred["z_enc_mu"]
    logvar = y_pred["z_enc_logvar"]

    n, dx = x.shape
    z = mu.shape[1]

    # Lane-dense layout for the (N, 1) sensitive-attribute path.
    s_dec_flat = s_dec.reshape(1, n)
    s_flat = s.reshape(1, n)           # == s.unsqueeze(-1).float() targets

    if tb is None:
        tb = _choose_tb(n, dx, z, x.dtype.itemsize, mu.dtype.itemsize)
    tb = max(8, (int(tb) // 8) * 8)

    total_tiles = pl.cdiv(n, tb)
    nc = num_core_splits if total_tiles >= num_core_splits else 1
    tiles_per_core = pl.cdiv(total_tiles, nc)
    padded_tiles = nc * tiles_per_core
    need_clamp = padded_tiles > total_tiles      # some (c, i) map past the last real tile
    need_mask = padded_tiles * tb > n            # some rows in some tile are padding

    def tile_idx(c, i):
        gt = c * tiles_per_core + i
        if need_clamp:
            gt = jnp.minimum(gt, total_tiles - 1)   # duplicate tile, fully masked in-kernel
        return gt

    kernel = functools.partial(_vfae_loss_kernel, n=n, tb=tb,
                               tiles_per_core=tiles_per_core,
                               need_mask=need_mask)

    scal = jnp.stack([jnp.asarray(alpha, jnp.float32),
                      jnp.asarray(1.0 / n, jnp.float32),
                      jnp.asarray(1.0 / (n * dx), jnp.float32)])

    out = pl.pallas_call(
        kernel,
        out_shape=jax.ShapeDtypeStruct((nc, 8, 128), jnp.float32),
        grid=(nc, tiles_per_core),
        in_specs=[
            pl.BlockSpec(memory_space=pltpu.MemorySpace.SMEM),          # [alpha, 1/n, 1/(n*dx)]
            pl.BlockSpec((tb, dx), lambda c, i: (tile_idx(c, i), 0)),   # x_decoded
            pl.BlockSpec((tb, dx), lambda c, i: (tile_idx(c, i), 0)),   # x
            pl.BlockSpec((1, n), lambda c, i: (0, 0)),                  # s_decoded (lane-dense)
            pl.BlockSpec((1, n), lambda c, i: (0, 0)),                  # s         (lane-dense)
            pl.BlockSpec((tb, z), lambda c, i: (tile_idx(c, i), 0)),    # z_enc_mu
            pl.BlockSpec((tb, z), lambda c, i: (tile_idx(c, i), 0)),    # z_enc_logvar
        ],
        out_specs=pl.BlockSpec((1, 8, 128), lambda c, i: (c, 0, 0)),
        scratch_shapes=[pltpu.VMEM((8, dx), jnp.float32),
                        pltpu.VMEM((8, z), jnp.float32)],
        compiler_params=pltpu.CompilerParams(
            dimension_semantics=("parallel", "arbitrary"),
            vmem_limit_bytes=32 * 1024 * 1024),
    )(scal, x_dec, x, s_dec_flat, s_flat, mu, logvar)

    # Sum the per-core partials (2 numbers).
    return jnp.sum(out[:, 0, 0])


def _vfae_loss_ref(y_pred, x, y, s, alpha=0.7):
    """Pure-JAX reference for correctness checking."""
    mse = jnp.mean((y_pred["x_decoded"].astype(jnp.float32) - x.astype(jnp.float32)) ** 2)
    st = s.reshape(-1, 1).astype(jnp.float32)
    sd = y_pred["s_decoded"].astype(jnp.float32)
    bce = jnp.mean(jnp.maximum(sd, 0.0) - sd * st + jnp.log1p(jnp.exp(-jnp.abs(sd))))
    lv = y_pred["z_enc_logvar"].astype(jnp.float32)
    mu = y_pred["z_enc_mu"].astype(jnp.float32)
    kl = jnp.mean(0.5 * jnp.sum(jnp.exp(lv) + mu * mu - lv - 1.0, axis=1))
    return mse + alpha * bce + kl


if __name__ == "__main__":
    N, DX, Z = 200, 32, 16  # small synthetic shapes

    key = jax.random.PRNGKey(0)
    k = jax.random.split(key, 6)
    x = jax.random.normal(k[0], (N, DX), dtype=jnp.float32)
    y_pred = {
        "x_decoded": jax.random.normal(k[1], (N, DX), dtype=jnp.float32),
        "s_decoded": jax.random.normal(k[2], (N, 1), dtype=jnp.float32),
        "z_enc_mu": 0.5 * jax.random.normal(k[3], (N, Z), dtype=jnp.float32),
        "z_enc_logvar": 0.3 * jax.random.normal(k[4], (N, Z), dtype=jnp.float32),
        # z1_enc_logvar only used via zeros_like in the reference:
        "z1_enc_logvar": jnp.zeros((N, Z), dtype=jnp.float32),
    }
    y = jnp.zeros((N,), dtype=jnp.int32)                              # unused by the loss
    s = (jax.random.uniform(k[5], (N,)) > 0.5).astype(jnp.float32)    # binary sensitive attr

    ref = jax.block_until_ready(_vfae_loss_ref(y_pred, x, y, s, alpha=0.7))

    # Multi-tile path: grid=(2, 4), exercises accumulation, row masking and
    # tile-index clamping (the 2-core split on v7x).
    loss_tiled = jax.block_until_ready(vfae_loss(y_pred, x, y, s, alpha=0.7, tb=32))
    # Auto-tiled path: TB picked from the VMEM budget (single tile here).
    loss_auto = jax.block_until_ready(vfae_loss(y_pred, x, y, s, alpha=0.7))

    assert jnp.allclose(loss_tiled, ref, rtol=1e-4, atol=1e-4), (loss_tiled, ref)
    assert jnp.allclose(loss_auto, ref, rtol=1e-4, atol=1e-4), (loss_auto, ref)
    print("KERNEL_OK")
</pallas_src>

<mosaic_0001>
module attributes {stable_mosaic.version = 11 : i64} {
  func.func @_vfae_loss_kernel(%arg0: i32, %arg1: i32, %arg2: memref<3xf32, #tpu.memory_space<smem>>, %arg3: memref<32x32xf32, #tpu.memory_space<vmem>>, %arg4: memref<32x32xf32, #tpu.memory_space<vmem>>, %arg5: memref<1x200xf32, #tpu.memory_space<vmem>>, %arg6: memref<1x200xf32, #tpu.memory_space<vmem>>, %arg7: memref<32x16xf32, #tpu.memory_space<vmem>>, %arg8: memref<32x16xf32, #tpu.memory_space<vmem>>, %arg9: memref<1x8x128xf32, #tpu.memory_space<vmem>>, %arg10: memref<8x32xf32, #tpu.memory_space<vmem>>, %arg11: memref<8x16xf32, #tpu.memory_space<vmem>>) attributes {dimension_semantics = [#tpu.dimension_semantics<parallel>, #tpu.dimension_semantics<arbitrary>], iteration_bounds = array<i64: 2, 4>, scalar_prefetch = 0 : i64, scratch_operands = 2 : i64, tpu.core_type = #tpu.core_type<tc>, window_params = [{transform_indices = @transform_0, window_bounds = array<i64: 3>}, {transform_indices = @transform_1, window_bounds = array<i64: 32, 32>}, {transform_indices = @transform_2, window_bounds = array<i64: 32, 32>}, {pipeline_mode = #tpu.pipeline_mode<synchronous>, transform_indices = @transform_3, window_bounds = array<i64: 1, 200>}, {pipeline_mode = #tpu.pipeline_mode<synchronous>, transform_indices = @transform_4, window_bounds = array<i64: 1, 200>}, {transform_indices = @transform_5, window_bounds = array<i64: 32, 16>}, {transform_indices = @transform_6, window_bounds = array<i64: 32, 16>}, {transform_indices = @transform_7, window_bounds = array<i64: 1, 8, 128>}]} {
    %c0_i32 = arith.constant 0 : i32
    %0 = arith.cmpi eq, %arg1, %c0_i32 : i32
    %1 = arith.extui %0 : i1 to i32
    %c0_i32_0 = arith.constant 0 : i32
    %2 = arith.cmpi ne, %1, %c0_i32_0 : i32
    scf.if %2 {
      %cst_20 = arith.constant 0.000000e+00 : f32
      %58 = vector.broadcast %cst_20 : f32 to vector<8x32xf32>
      %c0_21 = arith.constant 0 : index
      %c0_22 = arith.constant 0 : index
      %59 = vector.load %arg10[%c0_21, %c0_22] : memref<8x32xf32, #tpu.memory_space<vmem>>, vector<8x32xf32>
      tpu.vector_store %arg10[%c0_21, %c0_22], %58 {strides = array<i32>} : memref<8x32xf32, #tpu.memory_space<vmem>>, vector<8x32xf32>,
      %cst_23 = arith.constant 0.000000e+00 : f32
      %60 = vector.broadcast %cst_23 : f32 to vector<8x16xf32>
      %c0_24 = arith.constant 0 : index
      %c0_25 = arith.constant 0 : index
      %61 = vector.load %arg11[%c0_24, %c0_25] : memref<8x16xf32, #tpu.memory_space<vmem>>, vector<8x16xf32>
      tpu.vector_store %arg11[%c0_24, %c0_25], %60 {strides = array<i32>} : memref<8x16xf32, #tpu.memory_space<vmem>>, vector<8x16xf32>,
    } else {
    }
    %c0 = arith.constant 0 : index
    %c0_1 = arith.constant 0 : index
    %3 = vector.load %arg3[%c0, %c0_1] : memref<32x32xf32, #tpu.memory_space<vmem>>, vector<32x32xf32>
    %c0_2 = arith.constant 0 : index
    %c0_3 = arith.constant 0 : index
    %4 = vector.load %arg4[%c0_2, %c0_3] : memref<32x32xf32, #tpu.memory_space<vmem>>, vector<32x32xf32>
    %c0_4 = arith.constant 0 : index
    %c0_5 = arith.constant 0 : index
    %5 = vector.load %arg7[%c0_4, %c0_5] : memref<32x16xf32, #tpu.memory_space<vmem>>, vector<32x16xf32>
    %c0_6 = arith.constant 0 : index
    %c0_7 = arith.constant 0 : index
    %6 = vector.load %arg8[%c0_6, %c0_7] : memref<32x16xf32, #tpu.memory_space<vmem>>, vector<32x16xf32>
    %7 = arith.subf %3, %4 : vector<32x32xf32>
    %c4_i32 = arith.constant 4 : i32
    %8 = arith.muli %arg0, %c4_i32 : i32
    %9 = arith.addi %8, %arg1 : i32
    %c32_i32 = arith.constant 32 : i32
    %10 = arith.muli %9, %c32_i32 : i32
    %11 = tpu.iota {dimensions = array<i32: 0>} : vector<32x1xi32>
    %12 = vector.broadcast %10 : i32 to vector<32x1xi32>
    %13 = arith.addi %12, %11 : vector<32x1xi32>
    %c200_i32 = arith.constant 200 : i32
    %14 = vector.broadcast %c200_i32 : i32 to vector<32x1xi32>
    %15 = arith.cmpi slt, %13, %14 : vector<32x1xi32>
    %cst = arith.constant 0.000000e+00 : f32
    %16 = vector.shape_cast %15 : vector<32x1xi1> to vector<32x1xi1>
    %17 = vector.broadcast %16 : vector<32x1xi1> to vector<32x32xi1>
    %18 = vector.broadcast %cst : f32 to vector<32x32xf32>
    %19 = arith.select %17, %7, %18 : vector<32x32xi1>, vector<32x32xf32>
    %cst_8 = arith.constant 0.000000e+00 : f32
    %20 = vector.shape_cast %15 : vector<32x1xi1> to vector<32x1xi1>
    %21 = vector.broadcast %20 : vector<32x1xi1> to vector<32x16xi1>
    %22 = vector.broadcast %cst_8 : f32 to vector<32x16xf32>
    %23 = arith.select %21, %5, %22 : vector<32x16xi1>, vector<32x16xf32>
    %cst_9 = arith.constant 0.000000e+00 : f32
    %24 = vector.shape_cast %15 : vector<32x1xi1> to vector<32x1xi1>
    %25 = vector.broadcast %24 : vector<32x1xi1> to vector<32x16xi1>
    %26 = vector.broadcast %cst_9 : f32 to vector<32x16xf32>
    %27 = arith.select %25, %6, %26 : vector<32x16xi1>, vector<32x16xf32>
    %c0_10 = arith.constant 0 : index
    %c0_11 = arith.constant 0 : index
    %28 = vector.load %arg10[%c0_10, %c0_11] : memref<8x32xf32, #tpu.memory_space<vmem>>, vector<8x32xf32>
    %29 = arith.mulf %19, %19 : vector<32x32xf32>
    %30 = vector.extract_strided_slice %29 {offsets = [0, 0], sizes = [8, 32], strides = [1, 1]} : vector<32x32xf32> to vector<8x32xf32>
    %31 = vector.extract_strided_slice %29 {offsets = [8, 0], sizes = [8, 32], strides = [1, 1]} : vector<32x32xf32> to vector<8x32xf32>
    %32 = arith.addf %30, %31 : vector<8x32xf32>
    %33 = vector.extract_strided_slice %29 {offsets = [16, 0], sizes = [8, 32], strides = [1, 1]} : vector<32x32xf32> to vector<8x32xf32>
    %34 = arith.addf %32, %33 : vector<8x32xf32>
    %35 = vector.extract_strided_slice %29 {offsets = [24, 0], sizes = [8, 32], strides = [1, 1]} : vector<32x32xf32> to vector<8x32xf32>
    %36 = arith.addf %34, %35 : vector<8x32xf32>
    %37 = arith.addf %28, %36 : vector<8x32xf32>
    %c0_12 = arith.constant 0 : index
    %c0_13 = arith.constant 0 : index
    %38 = vector.load %arg10[%c0_12, %c0_13] : memref<8x32xf32, #tpu.memory_space<vmem>>, vector<8x32xf32>
    tpu.vector_store %arg10[%c0_12, %c0_13], %37 {strides = array<i32>} : memref<8x32xf32, #tpu.memory_space<vmem>>, vector<8x32xf32>,
    %39 = math.exp %27 : vector<32x16xf32>
    %40 = arith.mulf %23, %23 : vector<32x16xf32>
    %41 = arith.addf %39, %40 : vector<32x16xf32>
    %42 = arith.subf %41, %27 : vector<32x16xf32>
    %cst_14 = arith.constant 1.000000e+00 : f32
    %43 = vector.broadcast %cst_14 : f32 to vector<32x16xf32>
    %44 = arith.subf %42, %43 : vector<32x16xf32>
    %c0_15 = arith.constant 0 : index
    %c0_16 = arith.constant 0 : index
    %45 = vector.load %arg11[%c0_15, %c0_16] : memref<8x16xf32, #tpu.memory_space<vmem>>, vector<8x16xf32>
    %46 = vector.extract_strided_slice %44 {offsets = [0, 0], sizes = [8, 16], strides = [1, 1]} : vector<32x16xf32> to vector<8x16xf32>
    %47 = vector.extract_strided_slice %44 {offsets = [8, 0], sizes = [8, 16], strides = [1, 1]} : vector<32x16xf32> to vector<8x16xf32>
    %48 = arith.addf %46, %47 : vector<8x16xf32>
    %49 = vector.extract_strided_slice %44 {offsets = [16, 0], sizes = [8, 16], strides = [1, 1]} : vector<32x16xf32> to vector<8x16xf32>
    %50 = arith.addf %48, %49 : vector<8x16xf32>
    %51 = vector.extract_strided_slice %44 {offsets = [24, 0], sizes = [8, 16], strides = [1, 1]} : vector<32x16xf32> to vector<8x16xf32>
    %52 = arith.addf %50, %51 : vector<8x16xf32>
    %53 = arith.addf %45, %52 : vector<8x16xf32>
    %c0_17 = arith.constant 0 : index
    %c0_18 = arith.constant 0 : index
    %54 = vector.load %arg11[%c0_17, %c0_18] : memref<8x16xf32, #tpu.memory_space<vmem>>, vector<8x16xf32>
    tpu.vector_store %arg11[%c0_17, %c0_18], %53 {strides = array<i32>} : memref<8x16xf32, #tpu.memory_space<vmem>>, vector<8x16xf32>,
    %c3_i32 = arith.constant 3 : i32
    %55 = arith.cmpi eq, %arg1, %c3_i32 : i32
    %56 = arith.extui %55 : i1 to i32
    %c0_i32_19 = arith.constant 0 : i32
    %57 = arith.cmpi ne, %56, %c0_i32_19 : i32
    scf.if %57 {
      %c0_20 = arith.constant 0 : index
      %58 = memref.load %arg2[%c0_20] : memref<3xf32, #tpu.memory_space<smem>>
      %c1 = arith.constant 1 : index
      %59 = memref.load %arg2[%c1] : memref<3xf32, #tpu.memory_space<smem>>
      %c2 = arith.constant 2 : index
      %60 = memref.load %arg2[%c2] : memref<3xf32, #tpu.memory_space<smem>>
      %c0_21 = arith.constant 0 : index
      %c0_22 = arith.constant 0 : index
      %61 = vector.load %arg10[%c0_21, %c0_22] : memref<8x32xf32, #tpu.memory_space<vmem>>, vector<8x32xf32>
      %62 = vector.shape_cast %61 : vector<8x32xf32> to vector<1x8x32xf32>
      %cst_23 = arith.constant dense<0.000000e+00> : vector<1xf32>
      %63 = vector.multi_reduction <add>, %62, %cst_23 [1, 2] : vector<1x8x32xf32> to vector<1xf32>
      %64 = vector.shape_cast %63 : vector<1xf32> to vector<1x1x1xf32>
      %65 = vector.extract %64[0, 0, 0] : f32 from vector<1x1x1xf32>
      %c0_24 = arith.constant 0 : index
      %c0_25 = arith.constant 0 : index
      %66 = vector.load %arg11[%c0_24, %c0_25] : memref<8x16xf32, #tpu.memory_space<vmem>>, vector<8x16xf32>
      %67 = vector.shape_cast %66 : vector<8x16xf32> to vector<1x8x16xf32>
      %cst_26 = arith.constant dense<0.000000e+00> : vector<1xf32>
      %68 = vector.multi_reduction <add>, %67, %cst_26 [1, 2] : vector<1x8x16xf32> to vector<1xf32>
      %69 = vector.shape_cast %68 : vector<1xf32> to vector<1x1x1xf32>
      %70 = vector.extract %69[0, 0, 0] : f32 from vector<1x1x1xf32>
      %c0_27 = arith.constant 0 : index
      %c0_28 = arith.constant 0 : index
      %71 = vector.load %arg5[%c0_27, %c0_28] : memref<1x200xf32, #tpu.memory_space<vmem>>, vector<1x200xf32>
      %c0_29 = arith.constant 0 : index
      %c0_30 = arith.constant 0 : index
      %72 = vector.load %arg6[%c0_29, %c0_30] : memref<1x200xf32, #tpu.memory_space<vmem>>, vector<1x200xf32>
      %cst_31 = arith.constant 0.000000e+00 : f32
      %73 = vector.broadcast %cst_31 : f32 to vector<1x200xf32>
      %74 = arith.maximumf %71, %73 : vector<1x200xf32>
      %75 = arith.mulf %71, %72 : vector<1x200xf32>
      %76 = arith.subf %74, %75 : vector<1x200xf32>
      %77 = math.absf %71 : vector<1x200xf32>
      %cst_32 = arith.constant 0.000000e+00 : f32
      %78 = vector.broadcast %cst_32 : f32 to vector<1x200xf32>
      %79 = arith.subf %78, %77 : vector<1x200xf32>
      %80 = math.exp %79 : vector<1x200xf32>
      %81 = math.log1p %80 : vector<1x200xf32>
      %82 = arith.addf %76, %81 : vector<1x200xf32>
      %83 = vector.shape_cast %82 : vector<1x200xf32> to vector<1x1x200xf32>
      %cst_33 = arith.constant dense<0.000000e+00> : vector<1xf32>
      %84 = vector.multi_reduction <add>, %83, %cst_33 [1, 2] : vector<1x1x200xf32> to vector<1xf32>
      %85 = vector.shape_cast %84 : vector<1xf32> to vector<1x1x1xf32>
      %86 = vector.extract %85[0, 0, 0] : f32 from vector<1x1x1xf32>
      %87 = arith.mulf %65, %60 : f32
      %cst_34 = arith.constant 5.000000e-01 : f32
      %88 = arith.mulf %cst_34, %70 : f32
      %89 = arith.mulf %88, %59 : f32
      %90 = arith.addf %87, %89 : f32
      %c0_i32_35 = arith.constant 0 : i32
      %91 = arith.cmpi eq, %arg0, %c0_i32_35 : i32
      %92 = arith.mulf %58, %59 : f32
      %93 = arith.mulf %92, %86 : f32
      %cst_36 = arith.constant 0.000000e+00 : f32
      %94 = arith.select %91, %93, %cst_36 : f32
      %95 = arith.addf %90, %94 : f32
      %96 = vector.broadcast %95 : f32 to vector<1x8x128xf32>
      %c0_37 = arith.constant 0 : index
      %c0_38 = arith.constant 0 : index
      %c0_39 = arith.constant 0 : index
      %97 = vector.load %arg9[%c0_37, %c0_38, %c0_39] : memref<1x8x128xf32, #tpu.memory_space<vmem>>, vector<1x8x128xf32>
      tpu.vector_store %arg9[%c0_37, %c0_38, %c0_39], %96 {strides = array<i32>} : memref<1x8x128xf32, #tpu.memory_space<vmem>>, vector<1x8x128xf32>,
    } else {
    }
    return
  }
  func.func @transform_0(%arg0: i32, %arg1: i32) -> i32 {
    %c0_i32 = arith.constant 0 : i32
    %c0_i32_0 = arith.constant 0 : i32
    return %c0_i32 : i32
  }
  func.func @transform_1(%arg0: i32, %arg1: i32) -> (i32, i32) {
    %c4_i32 = arith.constant 4 : i32
    %0 = arith.muli %arg0, %c4_i32 : i32
    %1 = arith.addi %0, %arg1 : i32
    %c6_i32 = arith.constant 6 : i32
    %2 = arith.minsi %1, %c6_i32 : i32
    %c0_i32 = arith.constant 0 : i32
    %c0_i32_0 = arith.constant 0 : i32
    return %2, %c0_i32 : i32, i32
  }
  func.func @transform_2(%arg0: i32, %arg1: i32) -> (i32, i32) {
    %c4_i32 = arith.constant 4 : i32
    %0 = arith.muli %arg0, %c4_i32 : i32
    %1 = arith.addi %0, %arg1 : i32
    %c6_i32 = arith.constant 6 : i32
    %2 = arith.minsi %1, %c6_i32 : i32
    %c0_i32 = arith.constant 0 : i32
    %c0_i32_0 = arith.constant 0 : i32
    return %2, %c0_i32 : i32, i32
  }
  func.func @transform_3(%arg0: i32, %arg1: i32) -> (i32, i32) {
    %c0_i32 = arith.constant 0 : i32
    %c0_i32_0 = arith.constant 0 : i32
    %c0_i32_1 = arith.constant 0 : i32
    return %c0_i32, %c0_i32_0 : i32, i32
  }
  func.func @transform_4(%arg0: i32, %arg1: i32) -> (i32, i32) {
    %c0_i32 = arith.constant 0 : i32
    %c0_i32_0 = arith.constant 0 : i32
    %c0_i32_1 = arith.constant 0 : i32
    return %c0_i32, %c0_i32_0 : i32, i32
  }
  func.func @transform_5(%arg0: i32, %arg1: i32) -> (i32, i32) {
    %c4_i32 = arith.constant 4 : i32
    %0 = arith.muli %arg0, %c4_i32 : i32
    %1 = arith.addi %0, %arg1 : i32
    %c6_i32 = arith.constant 6 : i32
    %2 = arith.minsi %1, %c6_i32 : i32
    %c0_i32 = arith.constant 0 : i32
    %c0_i32_0 = arith.constant 0 : i32
    return %2, %c0_i32 : i32, i32
  }
  func.func @transform_6(%arg0: i32, %arg1: i32) -> (i32, i32) {
    %c4_i32 = arith.constant 4 : i32
    %0 = arith.muli %arg0, %c4_i32 : i32
    %1 = arith.addi %0, %arg1 : i32
    %c6_i32 = arith.constant 6 : i32
    %2 = arith.minsi %1, %c6_i32 : i32
    %c0_i32 = arith.constant 0 : i32
    %c0_i32_0 = arith.constant 0 : i32
    return %2, %c0_i32 : i32, i32
  }
  func.func @transform_7(%arg0: i32, %arg1: i32) -> (i32, i32, i32) {
    %c0_i32 = arith.constant 0 : i32
    %c0_i32_0 = arith.constant 0 : i32
    %c0_i32_1 = arith.constant 0 : i32
    return %arg0, %c0_i32, %c0_i32_0 : i32, i32, i32
  }
}

</mosaic_0001>

<bundles_post_ra>
// kernel: tpu_custom_call.1
= control target key start
LH: loop header
LB: loop body
LE: loop exit
PB: predicated region body
PF: predicated region fallthrough
CT: control target
= control target key end

     0   :  { %s1388_s0 = inlined_call_operand.vmem [shape: f32[3], index: 0, kind: input, shape index: {}]   ;;  %s1389_s1 = inlined_call_operand.vmem [shape: f32[200,32], index: 1, kind: input, shape index: {}]   ;;  %s1390_s2 = inlined_call_operand.vmem [shape: f32[200,32], index: 2, kind: input, shape index: {}]   ;;  %s1391_s3 = inlined_call_operand.vmem [shape: f32[1,200], index: 3, kind: input, shape index: {}]   ;;  %s1392_s4 = inlined_call_operand.vmem [shape: f32[1,200], index: 4, kind: input, shape index: {}]   ;;  %s1393_s5 = inlined_call_operand.vmem [shape: f32[200,16], index: 5, kind: input, shape index: {}]   ;;  %s1394_s6 = inlined_call_operand.vmem [shape: f32[200,16], index: 6, kind: input, shape index: {}]   ;;  %s1395_s7 = inlined_call_operand.hbm [shape: f32[2,8,128], index: 7, kind: output, shape index: {}]  }
   0x1   :  { %1401 = sst [smem:[#allocation16_spill]] %s1388_s0 }
   0x2   :  { %12 = vsyncpa [#allocation6], 0 }
   0x3   :  { %13 = vsyncpa [#allocation5], 0 }
   0x4   :  { %15 = vsyncpa [#allocation5 + $0x1], 0  ;;  %s1185_s24 = smov 0   ;;  %s1187_s25 = smov 0  }
   0x5   :  { %s1189_s26 = smov 0   ;;  %s1191_s27 = smov 0  }
   0x6   :  { %s1193_s28 = smov 0   ;;  %s1195_s29 = smov 0  }
   0x7   :  { %s1197_s30 = smov 0   ;;  %s1199_s8 = smov 0  }
   0x8 LB: > { %1402 = sst [smem:[#allocation10_spill]] %s1120_s26  ;;  %s886_s9 = sadd.s32 4294967295, %s1140_s8   ;;  %s1140_s8 = sphi %s1199_s8, %s21_s8   ;;  %s1136_s30 = sphi %s1197_s30, %s1423_s30   ;;  %s1132_s29 = sphi %s1195_s29, %s1419_s29   ;;  %s1128_s28 = sphi %s1193_s28, %s1418_s28   ;;  %s1124_s27 = sphi %s1191_s27, %s1417_s27   ;;  %s1120_s26 = sphi %s1189_s26, %s1416_s26   ;;  %s1116_s25 = sphi %s1187_s25, %s1422_s25   ;;  %s1112_s24 = sphi %s1185_s24, %s1421_s24  }
   0x9   : > { %1403 = sst [smem:[#allocation11_spill]] %s1132_s29  ;;  %s887_s10 = sadd.s32 4294967294, %s1140_s8  }
   0xa   : > { %1404 = sst [smem:[#allocation12_spill]] %s1136_s30  ;;  %s30_s11 = sadd.s32 1, %s1132_s29 }
   0xb   : > { %s33_s12 = sadd.s32 1, %s1136_s30  ;;  %p31_p0 = scmp.ge.s32.totalorder %s30_s11, 4 }
   0xc   : > { %s239_s13 = sadd.s32 1, %s1120_s26  ;;  %p249_p1 = scmp.ne.s32.totalorder %s1120_s26, %s1116_s25 }
   0xd   : > { %p250_p2 = scmp.eq.s32.totalorder %s886_s9, 7  ;;  %s1425_s11 = smov (%p31_p0, %s30_s11), 0 }
   0xe   : > { %1405 = sst [smem:[#allocation13_spill]] %s1425_s11  ;;  %s1427_s12 = smov (!%p31_p0, %s33_s12), %s1136_s30 }
   0xf   : > { %p1235_p3 = por %p250_p2, %p249_p1  ;;  %p255_p4 = scmp.ne.s32.totalorder %s1116_s25, %s1112_s24 }
  0x10   : > { %p35_p5 = scmp.ge.s32.totalorder %s1427_s12, 2  ;;  %p256_p6 = scmp.eq.s32.totalorder %s887_s10, 7 }
  0x11   : > { %p896_p7 = scmp.ge.s32.totalorder %s1140_s8, 1  ;;  %p263_p8 = scmp.lt.s32.totalorder %s1140_s8, 9 }
  0x12   : > { %s1429_s12 = smov (%p35_p5, %s1427_s12), 0  ;;  %p1245_p9 = por %p256_p6, %p255_p4 }
  0x13   : > { %1407 = sst [smem:[#allocation14_spill]] %s1429_s12  ;;  %p1249_p10 = pnand %p896_p7, %p263_p8 }
  0x14   : > { %s1408_s15 = scalar_select %p1245_p9, 1, 0 }
  0x15   : > { %s236_s17 = ssub.s32 %s1136_s30, %s1429_s12  ;;  %p940_p12 = pneg %p1249_p10 }
  0x16   : > { %p237_p11 = scmp.eq.s32.totalorder %s236_s17, 0  ;;  %p1257_p13 = scmp.eq.s32.totalorder %s886_s9, 0 }
  0x17   : > { %s1411_s0 = sld [smem:[#allocation16_spill]] }
  0x18   : > { %s1265_s22 = scalar_select %p237_p11, %s1120_s26, %s239_s13  }
  0x19   : > { %p941_p0 = pnand %p1257_p13, %p940_p12 }
  0x1a   : > { %1412 = sst [smem:[#allocation15_spill]] %s1265_s22 }
  0x1b   : > { %p1031_p2 = pneg %p941_p0 }
  0x1d   : > { %s276_s21 = sshll.u32 %s1411_s0, 4  ;;  %s277_s21 = int_to_ptr.vmem [resolvable:$true] %s276_s21 }
  0x1e   : > { %s1029_s23 = scalar_lea.vmem %s277_s21, 16  ;;  %p1037_p6 = scmp.lt.s32.totalorder %s277_s21, %s277_s21 }
  0x1f   : > { %p1030_p1 = scmp.ne.s32.totalorder %s277_s21, %s1029_s23  ;;  %p1038_p7 = scmp.lt.s32.totalorder %s1029_s23, %s1029_s23 }
  0x21   : > { %p1032_p4 = pnand %p1031_p2, %p1030_p1  ;;  %p1039_p8 = por %p1038_p7, %p1037_p6 }
  0x23   : > { %p1033_p5 = pneg %p1032_p4 }
  0x25   : > { %p1040_p9 = pnand %p1039_p8, %p1033_p5 }
  0x27   : > { %1043 = shalt.err (!%p1040_p9)
}
  0x28   : > { %s1142_s9 = smov [#allocation4]   ;;  %395 = sbr.rel (%p1249_p10) target bundleno = 386 (0x182), region = 48 }
  0x29   : > { %943 = dma.vmem_to_smem (!%p941_p0), %s277_s21, 16, %s1142_s9, [#allocation6]  }
  0x2d   : > { %1103 = dma.done.wait (%p1257_p13), [#allocation6], 16  }
  0x2e   : > { %1105 = vsyncadd (%p1257_p13), [#allocation6], 4294967280 }
  0x2f   : > { %401 = sfence }
  0x30   : > { %s1399_s10 = sand.u32 1, %s1116_s25   ;;  %s902_s13 = sshll.u32 %s1128_s28, 2 }
  0x31   : > { %s1279_s17 = sshll.u32 %s1399_s10, 3  ;;  %s476_s19 = sadd.s32 %s1124_s27, %s902_s13 }
  0x32   : > { %p477_p9 = scmp.lt.s32.totalorder %s476_s19, 6  ;;  %s474_s26 = scalar_lea.vmem [#allocation7], %s1279_s17 }
  0x33   : > { %p914_p11 = scmp.ne.s32.totalorder %s1124_s27, 0 }
  0x34   : > { %s478_s16 = scalar_select %p477_p9, %s476_s19, 6 }
  0x36   : > { %s903_s20 = sshll.u32 %s478_s16, 2 }
  0x37   : > { %p484_p10 = scmp.lt.s32.totalorder %s903_s20, 24 }
  0x38   : > { %566 = sbr.rel (%p914_p11) target bundleno = 64 (0x40), region = 56 }
  0x39   : > { %s1431_s20 = smov (!%p484_p10, %s903_s20), 24 }
  0x3a   : > { %s904_s21 = sshll.u32 %s1431_s20, 3 }
  0x3b   : > { %s487_s9 = scalar_lea.vmem %s1389_s1, %s904_s21  ;;  %s509_s11 = scalar_lea.vmem %s1390_s2, %s904_s21 }
  0x3c   : > { %s1291_s10 = scalar_lea.vmem %s1393_s5, %s904_s21  ;;  %s1296_s16 = scalar_lea.vmem %s1394_s6, %s904_s21 }
  0x3d   : > { %vm567_vm0 = vcmask 261120   ;;  %vm569_vm1 = vcmask 130048   ;;  %v1143_v0 = vmov 0.0  }
  0x3e   : > { %568 = vst.msk [vmem:[#allocation2] sm:$0xff] %vm567_vm0, %v1143_v0 }
  0x3f   : > { %570 = vst.msk [vmem:[#allocation3] sm:$0xff] %vm569_vm1, %v1143_v0 }
  0x40 PF: > { %v571_v1 = vld [vmem:[%s487_s9] sm:$0xff]  ;;  %v572_v2 = vld [vmem:[%s487_s9 + $0x8] sm:$0xff]  ;;  %s916_s0 = sshll.u32 %s476_s19, 5  ;;  %v594_v3 = vlaneseq  ;;  %v573_v4 = vld [vmem:[%s487_s9 + $0x10] sm:$0xff]  ;;  %vm637_vm6 = vcmask 261120   ;;  %vm668_vm7 = vcmask 130048  }
  0x41   : > { %v574_v5 = vld [vmem:[%s487_s9 + $0x18] sm:$0xff]  ;;  %v575_v6 = vld [vmem:[%s509_s11] sm:$0xff]  ;;  %v599_v7 = vstv %s916_s0  ;;  %v576_v8 = vld [vmem:[%s509_s11 + $0x8] sm:$0xff]  ;;  %p921_p12 = scmp.ne.s32.totalorder %s1124_s27, 3 }
  0x42   : > { %v577_v9 = vld [vmem:[%s509_s11 + $0x10] sm:$0xff]  ;;  %v578_v10 = vld [vmem:[%s509_s11 + $0x18] sm:$0xff]  ;;  %v1300_v11 = vshrl.u32 %v594_v3, 7  ;;  %v587_v12 = vsub.f32 %v571_v1, %v575_v6  ;;  %v588_v17 = vsub.f32 %v572_v2, %v576_v8  ;;  %v583_v23 = vld [vmem:[%s1296_s16] sm:$0xff]  ;;  %s674_s12 = sld [smem:[#allocation4]] (!%p921_p12)  ;;  %p747_p13 = scmp.eq.s32.totalorder (!%p921_p12), %s1128_s28, 0 }
  0x43   : > { %v589_v18 = vsub.f32 %v573_v4, %v577_v9  ;;  %v590_v19 = vsub.f32 %v574_v5, %v578_v10  ;;  %v584_v26 = vld [vmem:[%s1296_s16 + $0x8] sm:$0xff]  ;;  %v585_v27 = vld [vmem:[%s1296_s16 + $0x10] sm:$0xff]  ;;  %v586_v28 = vld [vmem:[%s1296_s16 + $0x18] sm:$0xff]  ;;  %s923_s22 = sld [smem:[#allocation4 + $0x2]] (!%p921_p12) }
  0x44   : > { %v596_v13 = vadd.s32 8, %v1300_v11  ;;  %v597_v14 = vadd.s32 16, %v1300_v11  ;;  %v598_v15 = vadd.s32 24, %v1300_v11  ;;  %v600_v16 = vadd.s32 %v599_v7, %v1300_v11  ;;  %v579_v48 = vld [vmem:[%s1291_s10] sm:$0xff]  ;;  %v580_v49 = vld [vmem:[%s1291_s10 + $0x8] sm:$0xff]  ;;  %v581_v50 = vld [vmem:[%s1291_s10 + $0x10] sm:$0xff] }
  0x45   : > { %v628_v45 = vld [vmem:[#allocation2] sm:$0xff]  ;;  %v582_v51 = vld [vmem:[%s1291_s10 + $0x18] sm:$0xff]  ;;  %s922_s19 = sld [smem:[#allocation4 + $0x1]] (!%p921_p12) }
  0x46   : > { %v601_v20 = vadd.s32 %v599_v7, %v596_v13  ;;  %v602_v21 = vadd.s32 %v599_v7, %v597_v14  ;;  %v603_v22 = vadd.s32 %v599_v7, %v598_v15  ;;  %vm604_vm2 = vcmp.lt.s32.totalorder %v600_v16, 200  ;;  %v663_v15 = vld [vmem:[#allocation3] sm:$0xff] }
  0x47   : > { %v616_v24 = vsel %vm604_vm2, %v587_v12, 0.0  ;;  %v624_v32 = vsel %vm604_vm2, %v583_v23, 0.0  ;;  %v620_v52 = vsel %vm604_vm2, %v579_v48, 0.0 }
  0x48   : > { %vm605_vm3 = vcmp.lt.s32.totalorder %v601_v20, 200  ;;  %vm606_vm4 = vcmp.lt.s32.totalorder %v602_v21, 200  ;;  %vm607_vm5 = vcmp.lt.s32.totalorder %v603_v22, 200  ;;  %v629_v25 = vmul.f32 %v616_v24, %v616_v24 }
  0x49   : > { %v617_v29 = vsel %vm605_vm3, %v588_v17, 0.0  ;;  %v618_v30 = vsel %vm606_vm4, %v589_v18, 0.0  ;;  %v619_v31 = vsel %vm607_vm5, %v590_v19, 0.0  ;;  %v625_v36 = vsel %vm605_vm3, %v584_v26, 0.0 }
  0x4a   : > { %v630_v33 = vmul.f32 %v617_v29, %v617_v29  ;;  %v631_v34 = vmul.f32 %v618_v30, %v618_v30  ;;  %v632_v35 = vmul.f32 %v619_v31, %v619_v31  ;;  %v626_v37 = vsel %vm606_vm4, %v585_v27, 0.0 }
  0x4b   : > { %v627_v38 = vsel %vm607_vm5, %v586_v28, 0.0  ;;  %v639_v40 = vmul.f32 1.442695, %v624_v32  ;;  %v641_v41 = vmul.f32 1.442695, %v625_v36  ;;  %v621_v53 = vsel %vm605_vm3, %v580_v49, 0.0  ;;  %s748_s18 = smul.f32 (!%p921_p12), %s922_s19, %s674_s12 }
  0x4c   : > { %v633_v39 = vadd.f32 %v630_v33, %v629_v25  ;;  %v643_v42 = vmul.f32 1.442695, %v626_v37  ;;  %v645_v43 = vmul.f32 1.442695, %v627_v38  ;;  %v622_v54 = vsel %vm606_vm4, %v581_v50, 0.0 }
  0x4d   : > { %1017 = vpow2.f32 %v639_v40  ;;  %v623_v55 = vsel %vm607_vm5, %v582_v51, 0.0  ;;  %v647_v56 = vmul.f32 %v620_v52, %v620_v52  ;;  %v648_v57 = vmul.f32 %v621_v53, %v621_v53 }
  0x4e   : > { %v634_v44 = vadd.f32 %v633_v39, %v631_v34  ;;  %1019 = vpow2.f32 %v641_v41  ;;  %v649_v58 = vmul.f32 %v622_v54, %v622_v54  ;;  %v650_v60 = vmul.f32 %v623_v55, %v623_v55 }
  0x4f   : > { %1021 = vpow2.f32 %v643_v42 }
  0x50   : > { %v635_v46 = vadd.f32 %v634_v44, %v632_v35  ;;  %1023 = vpow2.f32 %v645_v43 }
  0x52   : > { %v636_v47 = vadd.f32 %v635_v46, %v628_v45 }
  0x54   : > { %638 = vst.msk [vmem:[#allocation2] sm:$0xff] %vm637_vm6, %v636_v47 }
  0x5a   : > { %v1018_v59 = vpop.eup %1017 }
  0x5b   : > { %v1020_v61 = vpop.eup %1019  ;;  %v651_v62 = vadd.f32 %v1018_v59, %v647_v56 }
  0x5c   : > { %v1022_v63 = vpop.eup %1021  ;;  %v652_v0 = vadd.f32 %v1020_v61, %v648_v57 }
  0x5d   : > { %v1024_v1 = vpop.eup %1023  ;;  %v653_v2 = vadd.f32 %v1022_v63, %v649_v58  ;;  %v655_v3 = vsub.f32 %v651_v62, %v624_v32 }
  0x5e   : > { %v654_v4 = vadd.f32 %v1024_v1, %v650_v60  ;;  %v656_v5 = vsub.f32 %v652_v0, %v625_v36 }
  0x5f   : > { %v657_v6 = vsub.f32 %v653_v2, %v626_v37  ;;  %v917_v7 = vadd.f32 -1.0, %v655_v3 }
  0x60   : > { %v658_v8 = vsub.f32 %v654_v4, %v627_v38  ;;  %v918_v9 = vadd.f32 -1.0, %v656_v5 }
  0x61   : > { %v919_v10 = vadd.f32 -1.0, %v657_v6 }
  0x62   : > { %v920_v12 = vadd.f32 -1.0, %v658_v8  ;;  %v664_v13 = vadd.f32 %v918_v9, %v917_v7 }
  0x64   : > { %v665_v14 = vadd.f32 %v919_v10, %v664_v13 }
  0x66   : > { %v666_v16 = vadd.f32 %v920_v12, %v665_v14  ;;  %673 = sbr.rel (%p921_p12) target bundleno = 362 (0x16a), region = 60 }
  0x68   : > { %v667_v17 = vadd.f32 %v666_v16, %v663_v15 }
  0x6a   : > { %669 = vst.msk [vmem:[#allocation3] sm:$0xff] %vm668_vm7, %v667_v17 }
  0x6b   : > { %v677_v18 = vld [vmem:[#allocation2] sm:$0xff]  ;;  %v721_v38 = vsub.s32 0, %v1300_v11  ;;  %v725_v39 = vsub.s32 1, %v1300_v11  ;;  %vm729_vm9 = vcmask 1040384   ;;  %vm731_vm10 = vcmask 581632  }
  0x6c   : > { %v699_v20 = vld [vmem:[%s1391_s3] sm:$0x3]  ;;  %v678_v21 = vsel %vm637_vm6, %v677_v18, 0.0 }
  0x6d   : > { %679 = vadd.xlane.f32.xlu0 %v678_v21  ;;  %v704_v22 = vand.u32 2147483647, %v699_v20  ;;  %v700_v29 = vld [vmem:[%s1392_s4] sm:$0x3]  ;;  %v701_v31 = vmax.f32 %v699_v20, 0.0 }
  0x6e   : > { %v702_v32 = vmul.f32 %v700_v29, %v699_v20 }
  0x6f   : > { %v705_v24 = vsub.f32 0.0, %v704_v22 }
  0x70   : > { %v703_v36 = vsub.f32 %v701_v31, %v702_v32 }
  0x71   : > { %v688_v19 = vld [vmem:[#allocation3] sm:$0xff]  ;;  %v706_v25 = vmul.f32 1.442695, %v705_v24 }
  0x72   : > { %v689_v23 = vsel %vm668_vm7, %v688_v19, 0.0 }
  0x73   : > { %690 = vadd.xlane.f32.xlu0 %v689_v23  ;;  %1025 = vpow2.f32 %v706_v25 }
  0x80   : > { %v1026_v26 = vpop.eup %1025 }
  0x81   : > { %v708_v27 = vadd.f32 1.0, %v1026_v26  ;;  %v711_v28 = vmul.f32 -0.5, %v1026_v26  ;;  %v714_v33 = vand.u32 2147483647, %v1026_v26 }
  0x83   : > { %1027 = vlog2.f32 %v708_v27  ;;  %v712_v30 = vadd.f32 1.0, %v711_v28  ;;  %vm715_vm8 = vcmp.lt.f32.partialorder %v714_v33, 0.0004427343 }
  0x85   : > { %v713_v34 = vmul.f32 %v1026_v26, %v712_v30 }
  0x90   : > { %v1028_v35 = vpop.eup %1027 }
  0x91   : > { %v710_v37 = vmul.f32 0.6931472, %v1028_v35 }
  0x93   : > { %v716_v40 = vsel %vm715_vm8, %v713_v34, %v710_v37 }
  0x94   : > { %v717_v41 = vadd.f32 %v716_v40, %v703_v36 }
  0x96   : > { %v722_v42 = vrot.slane %v717_v41, %v721_v38  ;;  %v726_v43 = vrot.slane %v717_v41, %v725_v39 }
  0x98   : > { %v730_v44 = vsel %vm729_vm9, %v722_v42, 0.0  ;;  %v732_v45 = vsel %vm731_vm10, %v726_v43, 0.0 }
  0x99   : > { %v733_v46 = vadd.f32 %v732_v45, %v730_v44 }
  0x9b   : > { %734 = vadd.xlane.f32.xlu1 %v733_v46 }
  0xf6   : > { %v680_v47 = vpop.xlane.xlu0 %679 }
  0xf7   : > { %v681_v48 = vrot.slane %v680_v47, 4 }
  0xf9   : > { %v682_v49 = vadd.f32 %v681_v48, %v680_v47 }
  0xfb   : > { %v683_v51 = vrot.slane %v682_v49, 2 }
  0xfc   : > { %v691_v50 = vpop.xlane.xlu0 %690 }
  0xfd   : > { %v692_v52 = vrot.slane %v691_v50, 4  ;;  %v684_v54 = vadd.f32 %v683_v51, %v682_v49 }
  0xff   : > { %v693_v53 = vadd.f32 %v692_v52, %v691_v50  ;;  %v685_v11 = vrot.slane %v684_v54, 1 }
 0x101   : > { %v694_v55 = vrot.slane %v693_v53, 2  ;;  %v686_v57 = vadd.f32 %v685_v11, %v684_v54 }
 0x103   : > { %v695_v56 = vadd.f32 %v694_v55, %v693_v53  ;;  %928 = vpush %v686_v57 }
 0x105   : > { %v696_v58 = vrot.slane %v695_v56, 1 }
 0x107   : > { %v697_v59 = vadd.f32 %v696_v58, %v695_v56 }
 0x109   : > { %930 = vpush %v697_v59 }
 0x124   : > { %v735_v60 = vpop.xlane.xlu1 %734 }
 0x125   : > { %v736_v61 = vrot.slane %v735_v60, 4 }
 0x127   : > { %v737_v62 = vadd.f32 %v736_v61, %v735_v60 }
 0x129   : > { %v738_v63 = vrot.slane %v737_v62, 2 }
 0x12b   : > { %v739_v0 = vadd.f32 %v738_v63, %v737_v62 }
 0x12d   : > { %v740_v1 = vrot.slane %v739_v0, 1 }
 0x12f   : > { %v741_v2 = vadd.f32 %v740_v1, %v739_v0 }
 0x131   : > { %932 = vpush %v741_v2 }
 0x134   : > { %s929_s10 = spop %928 }
 0x135   : > { %s743_s23 = smul.f32 %s929_s10, %s923_s22 }
 0x13a   : > { %s931_s20 = spop %930 }
 0x13b   : > { %s744_s21 = smul.f32 0.5, %s931_s20 }
 0x13d   : > { %s745_s9 = smul.f32 %s922_s19, %s744_s21 }
 0x13f   : > { %s746_s0 = sadd.f32 %s745_s9, %s743_s23 }
 0x162   : > { %s933_s13 = spop %932 }
 0x163   : > { %s749_s16 = smul.f32 %s933_s13, %s748_s18 }
 0x165   : > { %s1433_s16 = smov (!%p747_p13, %s749_s16), 0.0 }
 0x166   : > { %s751_s29 = sadd.f32 %s1433_s16, %s746_s0 }
 0x168   : > { %v752_v3 = vstv %s751_s29 }
 0x169   : > { %753 = vst [vmem:[%s474_s26] sm:$0xff] %v752_v3 }
 0x16a PF: > { %s925_s30 = sshll.u32 %s1128_s28, 7  ;;  %s768_s22 = sshll.u32 %s474_s26, 4  ;;  %s769_s22 = int_to_ptr.vmem [resolvable:$true] %s768_s22 }
 0x16b   : > { %s766_s12 = scalar_lea.hbm %s1395_s7, %s925_s30  ;;  %s1413_s10 = sand.u32 1, %s1116_s25  }
 0x16c   : > { %s755_s19 = scalar_lea.sflag [#allocation5], %s1413_s10  ;;  %s1044_s20 = scalar_lea.vmem %s769_s22, 128 }
 0x16d   : > { %p1045_p0 = scmp.ne.s32.totalorder %s769_s22, %s1044_s20  ;;  %s1144_s21 = smov [#allocation7]  }
 0x16e   : > { %s1048_s18 = sshll.u32 %s1144_s21, 4  ;;  %s1049_s18 = int_to_ptr.vmem [resolvable:$false] %s1048_s18 }
 0x16f   : > { %p1046_p1 = pnand %p1045_p0, %p1235_p3  ;;  %s1050_s23 = scalar_lea.vmem %s1049_s18, 256 }
 0x170   : > { %p1051_p4 = scmp.lt.s32.totalorder %s769_s22, %s1049_s18  ;;  %p1052_p5 = scmp.lt.s32.totalorder %s1050_s23, %s1044_s20 }
 0x171   : > { %p1047_p2 = pneg %p1046_p1 }
 0x172   : > { %p1053_p6 = por %p1052_p5, %p1051_p4 }
 0x174   : > { %p1054_p7 = pnand %p1053_p6, %p1047_p2 }
 0x176   : > { %1057 = shalt.err (!%p1054_p7)
}
 0x177   : > { %s1058_s28 = scalar_lea.hbm %s766_s12, 128  ;;  %s1062_s9 = scalar_lea.hbm %s1395_s7, 256 }
 0x178   : > { %p1059_p8 = scmp.ne.s32.totalorder %s766_s12, %s1058_s28  ;;  %p1063_p11 = scmp.lt.s32.totalorder %s766_s12, %s1395_s7 }
 0x179   : > { %p1064_p12 = scmp.lt.s32.totalorder %s1062_s9, %s1058_s28 }
 0x17a   : > { %p1060_p9 = pnand %p1059_p8, %p1235_p3 }
 0x17b   : > { %p1065_p13 = por %p1064_p12, %p1063_p11 }
 0x17c   : > { %p1061_p10 = pneg %p1060_p9 }
 0x17e   : > { %p1066_p0 = pnand %p1065_p13, %p1061_p10 }
 0x180   : > { %1069 = shalt.err (!%p1066_p0)
}
 0x181   : > { %938 = dma.vmem_to_hbm [thread:$0]  (%p1235_p3), %s769_s22, 128, %s766_s12, %s755_s19  }
 0x182 PF: > { %p950_p1 = scmp.ge.s32.totalorder %s1140_s8, 2  ;;  %s780_s0 = sand.u32 1, %s1112_s24  }
 0x183   : > { %p1414_p2 = scmp.ne.s32.totalorder %s1408_s15, 0  ;;  %s781_s29 = scalar_lea.sflag [#allocation5], %s780_s0 }
 0x185   : > { %p945_p4 = pnand %p950_p1, %p1414_p2 }
 0x187   : > { %p946_p5 = pneg %p945_p4 }
 0x189   : > { %1107 = dma.done.wait (%p946_p5), %s781_s29, 128  }
 0x18a   : > { %1109 = vsyncadd (%p946_p5), %s781_s29, 4294967168  ;;  %s21_s8 = sadd.s32 1, %s1140_s8   ;;  %s1415_s30 = sld [smem:[#allocation10_spill]] }
 0x18b   : > { %p18_p6 = scmp.ge.s32.totalorder %s21_s8, 10   ;;  %s1416_s26 = sld [smem:[#allocation15_spill]] }
 0x18c   : > { %s1417_s27 = sld [smem:[#allocation11_spill]]  ;;  %s1421_s24 = smov %s1116_s25 }
 0x18d   : > { %s1418_s28 = sld [smem:[#allocation12_spill]] }
 0x18e   : > { %s1419_s29 = sld [smem:[#allocation13_spill]] }
 0x18f   : > { %s1420_s14 = sld [smem:[#allocation14_spill]] }
 0x190   : > { %s1422_s25 = smov %s1415_s30 }
 0x191   :  { %20 = sbr.rel (!%p18_p6) target bundleno = 8 (0x8), region = 105 }
 0x195   : > { %s1423_s30 = smov %s1420_s14 }
 0x196   :  { %786 = vsyncpa [#allocation5], 1 }
 0x197   :  { %788 = vsyncpa [#allocation5 + $0x1], 1 }
 0x198   :  { %789 = vsyncpa [#allocation6], 1 }
 0x199   :  { %791 = vsyncpa [#allocation6 + $0x1], 1 }

</bundles_post_ra>
